<compile_context>
chip_gen: v6e
topology: v6e:2x2x1
jax: 0.10.0
libtpu: 0.0.40
codegen_flags: <defaults>
</compile_context>

<pallas_src>
import jax
import jax.numpy as jnp
from jax.experimental import pallas as pl
from jax.experimental.pallas import tpu as pltpu


H1_PAD = 512    # 400 -> 512 (lane-dense)
H2_PAD = 384    # 300 -> 384 (lane-dense)
OUT_PAD = 128   # 1   -> 128 (lane-dense output block)


def _round_up(n, m):
    return ((n + m - 1) // m) * m


def _cdiv(a, b):
    return -(-a // b)


def _choose_tiling(B, max_rows_per_tile=2048):
    """Pick (tb, n_tiles, b_pad).

    n_tiles is chosen from B first (never pad a whole dead tile), tb is a
    multiple of 16 (bf16 sublane packing).  For batches big enough to feed
    two TensorCores (v7x), keep at least 2 tiles so the "parallel" grid axis
    can shard across cores.
    """
    min_tiles = 2 if B >= 512 else 1
    n_tiles = max(min_tiles, _cdiv(B, max_rows_per_tile))
    tb = _round_up(_cdiv(B, n_tiles), 16)
    b_pad = tb * n_tiles
    return tb, n_tiles, b_pad


def _critic_kernel(x_ref, w1_ref, b1_ref, w2_ref, b2_ref, w3_ref, b3_ref, o_ref):
    # Layer 1: [tb, S+A] @ [S+A, 512]  (single matmul; concat fused upstream)
    h1 = jnp.dot(x_ref[...], w1_ref[...],
                 preferred_element_type=jnp.float32) + b1_ref[...]
    h1 = jnp.maximum(h1, 0.0).astype(jnp.bfloat16)      # ReLU in f32, bf16 for MXU

    # Layer 2: [tb, 512] @ [512, 384]
    h2 = jnp.dot(h1, w2_ref[...],
                 preferred_element_type=jnp.float32) + b2_ref[...]
    h2 = jnp.maximum(h2, 0.0).astype(jnp.bfloat16)

    # Layer 3: [tb, 384] @ [384, 128] — only column 0 is the real q; the
    # 128-wide block gives an unmasked, lane-dense output store.
    q = jnp.dot(h2, w3_ref[...],
                preferred_element_type=jnp.float32) + b3_ref[...]
    o_ref[...] = q.astype(o_ref.dtype)


def critic_forward(state, action, packed_params, *, max_rows_per_tile=2048):
    """state: [B, S] f32, action: [B, A] f32 -> q: [B, 1] f32."""
    w1, b1, w2, b2, w3, b3 = packed_params
    B, S = state.shape
    A = action.shape[1]
    K = S + A
    H1 = w1.shape[1]
    H2 = w2.shape[1]
    NOUT = w3.shape[1]
    assert w1.shape[0] == K

    tb, n_tiles, b_pad = _choose_tiling(B, max_rows_per_tile)

    # Single concat (as in the PyTorch forward) + bf16 cast; pad only if the
    # batch is not already tile-aligned.  Best handled upstream (replay
    # buffer) — kept minimal here.
    x = jnp.concatenate([state, action], axis=1).astype(jnp.bfloat16)
    if b_pad != B:
        x = jnp.pad(x, ((0, b_pad - B), (0, 0)))

    const = lambda i: (0, 0)        # weights/biases: one block, VMEM-resident
    batch = lambda i: (i, 0)        # activations/output: tiled along batch

    flops = 2 * b_pad * (K * H1 + H1 * H2 + H2 * NOUT)
    bytes_accessed = (
        (K * H1 + H1 * H2 + H2 * NOUT) * 2      # bf16 weights
        + (H1 + H2 + NOUT) * 4                  # f32 biases
        + b_pad * K * 2                         # bf16 input
        + b_pad * NOUT * 4)                     # f32 output block

    out = pl.pallas_call(
        _critic_kernel,
        out_shape=jax.ShapeDtypeStruct((b_pad, NOUT), jnp.float32),
        grid_spec=pltpu.PrefetchScalarGridSpec(
            num_scalar_prefetch=0,
            grid=(n_tiles,),
            in_specs=[
                pl.BlockSpec((tb, K), batch),
                pl.BlockSpec((K, H1), const),
                pl.BlockSpec((1, H1), const),
                pl.BlockSpec((H1, H2), const),
                pl.BlockSpec((1, H2), const),
                pl.BlockSpec((H2, NOUT), const),
                pl.BlockSpec((1, NOUT), const),
            ],
            out_specs=pl.BlockSpec((tb, NOUT), batch),
        ),
        compiler_params=pltpu.CompilerParams(
            dimension_semantics=("parallel",),
            # Explicit limit: big tiles must also fit v5e's 16 MiB default
            # scoped VMEM; 48 MiB stays under v7x's 64 MiB physical.
            vmem_limit_bytes=48 * 1024 * 1024,
        ),
        cost_estimate=pl.CostEstimate(
            flops=flops, transcendentals=0, bytes_accessed=bytes_accessed),
    )(x, w1, b1, w2, b2, w3, b3)

    return out[:B, :1]


def init_params(key, state_dim, action_dim, hidden=(400, 300)):
    """Logical (unpadded) f32 params, PyTorch-Linear-style uniform fan-in init.
    Weights stored as [in_features, out_features]."""
    dims = [state_dim + action_dim, hidden[0], hidden[1], 1]
    params = []
    keys = jax.random.split(key, len(dims) - 1)
    for k, d_in, d_out in zip(keys, dims[:-1], dims[1:]):
        kw, kb = jax.random.split(k)
        bound = 1.0 / jnp.sqrt(jnp.float32(d_in))
        w = jax.random.uniform(kw, (d_in, d_out), jnp.float32, -bound, bound)
        b = jax.random.uniform(kb, (d_out,), jnp.float32, -bound, bound)
        params.extend([w, b])
    return tuple(params)


def pack_params(params, h1_pad=H1_PAD, h2_pad=H2_PAD, out_pad=OUT_PAD):
    """Zero-pad hidden/output dims to lane-dense sizes and cast weights to
    bf16 (biases stay f32).  Layer-3 weight becomes a [H2_PAD, 128] slab whose
    column 0 holds the real weights; zero padding is exact through ReLU."""
    w1, b1, w2, b2, w3, b3 = params
    k_in, h1 = w1.shape
    h2 = w2.shape[1]

    def pad2(x, rows, cols):
        return jnp.pad(x, ((0, rows - x.shape[0]), (0, cols - x.shape[1])))

    w1p = pad2(w1, k_in, h1_pad).astype(jnp.bfloat16)
    b1p = jnp.pad(b1, (0, h1_pad - h1)).reshape(1, h1_pad).astype(jnp.float32)

    w2p = pad2(w2, h1_pad, h2_pad).astype(jnp.bfloat16)
    b2p = jnp.pad(b2, (0, h2_pad - h2)).reshape(1, h2_pad).astype(jnp.float32)

    w3p = pad2(w3.reshape(h2, 1), h2_pad, out_pad).astype(jnp.bfloat16)
    b3p = jnp.pad(b3.reshape(1, 1), ((0, 0), (0, out_pad - 1))).astype(jnp.float32)
    return (w1p, b1p, w2p, b2p, w3p, b3p)


def _ref_forward(state, action, packed_params):
    """Pure-JAX reference using the same dtype pipeline as the kernel."""
    w1, b1, w2, b2, w3, b3 = packed_params
    x = jnp.concatenate([state, action], axis=1).astype(jnp.bfloat16)
    h1 = jnp.dot(x, w1, preferred_element_type=jnp.float32) + b1
    h1 = jnp.maximum(h1, 0.0).astype(jnp.bfloat16)
    h2 = jnp.dot(h1, w2, preferred_element_type=jnp.float32) + b2
    h2 = jnp.maximum(h2, 0.0).astype(jnp.bfloat16)
    q = jnp.dot(h2, w3, preferred_element_type=jnp.float32) + b3
    return q[:, :1]


if __name__ == "__main__":
    key = jax.random.PRNGKey(0)
    k_state, k_action, k_param = jax.random.split(key, 3)

    batch, state_dim, action_dim = 2, 16, 8
    state = jax.random.normal(k_state, (batch, state_dim), jnp.float32)
    action = jax.random.normal(k_action, (batch, action_dim), jnp.float32)

    params = init_params(k_param, state_dim, action_dim)
    packed = pack_params(params)

    q = critic_forward(state, action, packed)
    q = jax.block_until_ready(q)
    assert q.shape == (batch, 1)

    # Correctness vs a pure-JAX reference with an identical dtype pipeline.
    q_ref = _ref_forward(state, action, packed)
    assert jnp.allclose(q, q_ref, atol=1e-2, rtol=1e-2), (q, q_ref)

    # Loose check vs the full-f32 logical model (bf16 weights => coarse tol).
    w1, b1, w2, b2, w3, b3 = params
    x32 = jnp.concatenate([state, action], axis=1)
    h1_32 = jnp.maximum(x32 @ w1 + b1, 0.0)
    h2_32 = jnp.maximum(h1_32 @ w2 + b2, 0.0)
    q32 = (h2_32 @ w3 + b3)
    assert jnp.allclose(q, q32, atol=5e-2, rtol=5e-2), (q, q32)

    print("KERNEL_OK")
</pallas_src>

<mosaic_0001>
module attributes {stable_mosaic.version = 11 : i64} {
  func.func @_critic_kernel(%arg0: i32, %arg1: memref<16x24xbf16, #tpu.memory_space<vmem>>, %arg2: memref<24x512xbf16, #tpu.memory_space<vmem>>, %arg3: memref<1x512xf32, #tpu.memory_space<vmem>>, %arg4: memref<512x384xbf16, #tpu.memory_space<vmem>>, %arg5: memref<1x384xf32, #tpu.memory_space<vmem>>, %arg6: memref<384x128xbf16, #tpu.memory_space<vmem>>, %arg7: memref<1x128xf32, #tpu.memory_space<vmem>>, %arg8: memref<16x128xf32, #tpu.memory_space<vmem>>) attributes {dimension_semantics = [#tpu.dimension_semantics<parallel>], iteration_bounds = array<i64: 1>, scalar_prefetch = 0 : i64, scratch_operands = 0 : i64, tpu.core_type = #tpu.core_type<tc>, window_params = [{transform_indices = @transform_0, window_bounds = array<i64: 16, 24>}, {pipeline_mode = #tpu.pipeline_mode<synchronous>, transform_indices = @transform_1, window_bounds = array<i64: 24, 512>}, {pipeline_mode = #tpu.pipeline_mode<synchronous>, transform_indices = @transform_2, window_bounds = array<i64: 1, 512>}, {pipeline_mode = #tpu.pipeline_mode<synchronous>, transform_indices = @transform_3, window_bounds = array<i64: 512, 384>}, {pipeline_mode = #tpu.pipeline_mode<synchronous>, transform_indices = @transform_4, window_bounds = array<i64: 1, 384>}, {pipeline_mode = #tpu.pipeline_mode<synchronous>, transform_indices = @transform_5, window_bounds = array<i64: 384, 128>}, {pipeline_mode = #tpu.pipeline_mode<synchronous>, transform_indices = @transform_6, window_bounds = array<i64: 1, 128>}, {transform_indices = @transform_7, window_bounds = array<i64: 16, 128>}]} {
    %c0 = arith.constant 0 : index
    %c0_0 = arith.constant 0 : index
    %0 = vector.load %arg1[%c0, %c0_0] : memref<16x24xbf16, #tpu.memory_space<vmem>>, vector<16x24xbf16>
    %c0_1 = arith.constant 0 : index
    %c0_2 = arith.constant 0 : index
    %1 = vector.load %arg2[%c0_1, %c0_2] : memref<24x512xbf16, #tpu.memory_space<vmem>>, vector<24x512xbf16>
    %cst = arith.constant dense<0.000000e+00> : vector<16x512xf32>
    %2 = tpu.matmul %0, %1, %cst {dimension_numbers = #tpu.dot_dimension_numbers<[1], [0], [0], [1], [0, 0, 1, 1], [], []>} : vector<16x24xbf16>, vector<24x512xbf16>, vector<16x512xf32> -> vector<16x512xf32>
    %c0_3 = arith.constant 0 : index
    %c0_4 = arith.constant 0 : index
    %3 = vector.load %arg3[%c0_3, %c0_4] : memref<1x512xf32, #tpu.memory_space<vmem>>, vector<1x512xf32>
    %4 = vector.broadcast %3 : vector<1x512xf32> to vector<16x512xf32>
    %5 = arith.addf %2, %4 : vector<16x512xf32>
    %cst_5 = arith.constant 0.000000e+00 : f32
    %6 = vector.broadcast %cst_5 : f32 to vector<16x512xf32>
    %7 = arith.maximumf %5, %6 : vector<16x512xf32>
    %8 = arith.truncf %7 : vector<16x512xf32> to vector<16x512xbf16>
    %c0_6 = arith.constant 0 : index
    %c0_7 = arith.constant 0 : index
    %9 = vector.load %arg4[%c0_6, %c0_7] : memref<512x384xbf16, #tpu.memory_space<vmem>>, vector<512x384xbf16>
    %cst_8 = arith.constant dense<0.000000e+00> : vector<16x384xf32>
    %10 = tpu.matmul %8, %9, %cst_8 {dimension_numbers = #tpu.dot_dimension_numbers<[1], [0], [0], [1], [0, 0, 1, 1], [], []>} : vector<16x512xbf16>, vector<512x384xbf16>, vector<16x384xf32> -> vector<16x384xf32>
    %c0_9 = arith.constant 0 : index
    %c0_10 = arith.constant 0 : index
    %11 = vector.load %arg5[%c0_9, %c0_10] : memref<1x384xf32, #tpu.memory_space<vmem>>, vector<1x384xf32>
    %12 = vector.broadcast %11 : vector<1x384xf32> to vector<16x384xf32>
    %13 = arith.addf %10, %12 : vector<16x384xf32>
    %cst_11 = arith.constant 0.000000e+00 : f32
    %14 = vector.broadcast %cst_11 : f32 to vector<16x384xf32>
    %15 = arith.maximumf %13, %14 : vector<16x384xf32>
    %16 = arith.truncf %15 : vector<16x384xf32> to vector<16x384xbf16>
    %c0_12 = arith.constant 0 : index
    %c0_13 = arith.constant 0 : index
    %17 = vector.load %arg6[%c0_12, %c0_13] : memref<384x128xbf16, #tpu.memory_space<vmem>>, vector<384x128xbf16>
    %cst_14 = arith.constant dense<0.000000e+00> : vector<16x128xf32>
    %18 = tpu.matmul %16, %17, %cst_14 {dimension_numbers = #tpu.dot_dimension_numbers<[1], [0], [0], [1], [0, 0, 1, 1], [], []>} : vector<16x384xbf16>, vector<384x128xbf16>, vector<16x128xf32> -> vector<16x128xf32>
    %c0_15 = arith.constant 0 : index
    %c0_16 = arith.constant 0 : index
    %19 = vector.load %arg7[%c0_15, %c0_16] : memref<1x128xf32, #tpu.memory_space<vmem>>, vector<1x128xf32>
    %20 = vector.broadcast %19 : vector<1x128xf32> to vector<16x128xf32>
    %21 = arith.addf %18, %20 : vector<16x128xf32>
    %c0_17 = arith.constant 0 : index
    %c0_18 = arith.constant 0 : index
    %22 = vector.load %arg8[%c0_17, %c0_18] : memref<16x128xf32, #tpu.memory_space<vmem>>, vector<16x128xf32>
    tpu.vector_store %arg8[%c0_17, %c0_18], %21 {strides = array<i32>} : memref<16x128xf32, #tpu.memory_space<vmem>>, vector<16x128xf32>,
    return
  }
  func.func @transform_0(%arg0: i32) -> (i32, i32) {
    %c0_i32 = arith.constant 0 : i32
    %c0_i32_0 = arith.constant 0 : i32
    return %arg0, %c0_i32 : i32, i32
  }
  func.func @transform_1(%arg0: i32) -> (i32, i32) {
    %c0_i32 = arith.constant 0 : i32
    %c0_i32_0 = arith.constant 0 : i32
    %c0_i32_1 = arith.constant 0 : i32
    return %c0_i32, %c0_i32_0 : i32, i32
  }
  func.func @transform_2(%arg0: i32) -> (i32, i32) {
    %c0_i32 = arith.constant 0 : i32
    %c0_i32_0 = arith.constant 0 : i32
    %c0_i32_1 = arith.constant 0 : i32
    return %c0_i32, %c0_i32_0 : i32, i32
  }
  func.func @transform_3(%arg0: i32) -> (i32, i32) {
    %c0_i32 = arith.constant 0 : i32
    %c0_i32_0 = arith.constant 0 : i32
    %c0_i32_1 = arith.constant 0 : i32
    return %c0_i32, %c0_i32_0 : i32, i32
  }
  func.func @transform_4(%arg0: i32) -> (i32, i32) {
    %c0_i32 = arith.constant 0 : i32
    %c0_i32_0 = arith.constant 0 : i32
    %c0_i32_1 = arith.constant 0 : i32
    return %c0_i32, %c0_i32_0 : i32, i32
  }
  func.func @transform_5(%arg0: i32) -> (i32, i32) {
    %c0_i32 = arith.constant 0 : i32
    %c0_i32_0 = arith.constant 0 : i32
    %c0_i32_1 = arith.constant 0 : i32
    return %c0_i32, %c0_i32_0 : i32, i32
  }
  func.func @transform_6(%arg0: i32) -> (i32, i32) {
    %c0_i32 = arith.constant 0 : i32
    %c0_i32_0 = arith.constant 0 : i32
    %c0_i32_1 = arith.constant 0 : i32
    return %c0_i32, %c0_i32_0 : i32, i32
  }
  func.func @transform_7(%arg0: i32) -> (i32, i32) {
    %c0_i32 = arith.constant 0 : i32
    %c0_i32_0 = arith.constant 0 : i32
    return %arg0, %c0_i32 : i32, i32
  }
}

</mosaic_0001>

<bundles_post_ra>
// kernel: tpu_custom_call.1
= control target key start
LH: loop header
LB: loop body
LE: loop exit
PB: predicated region body
PF: predicated region fallthrough
CT: control target
= control target key end

     0   :  { %12 = vsyncpa [#allocation3], 0  ;;  %s2054_s0 = inlined_call_operand.hbm [shape: bf16[16,24], index: 0, kind: input, shape index: {}]   ;;  %s2055_s1 = inlined_call_operand.hbm [shape: bf16[24,512], index: 1, kind: input, shape index: {}]   ;;  %s2056_s2 = inlined_call_operand.hbm [shape: f32[1,512], index: 2, kind: input, shape index: {}]   ;;  %s2057_s3 = inlined_call_operand.hbm [shape: bf16[512,384], index: 3, kind: input, shape index: {}]   ;;  %s2058_s4 = inlined_call_operand.vmem [shape: f32[1,384], index: 4, kind: input, shape index: {}]   ;;  %s2059_s5 = inlined_call_operand.hbm [shape: bf16[384,128], index: 5, kind: input, shape index: {}]   ;;  %s2060_s6 = inlined_call_operand.vmem [shape: f32[1,128], index: 6, kind: input, shape index: {}]   ;;  %s2061_s7 = inlined_call_operand.hbm [shape: f32[16,128], index: 7, kind: output, shape index: {}]  }
   0x1   :  { %13 = vsyncpa [#allocation6], 0 }
   0x2   :  { %14 = vsyncpa [#allocation9], 0 }
   0x3   :  { %15 = vsyncpa [#allocation4], 0  ;;  %s1947_s24 = smov [#allocation5]  }
   0x4   :  { %s33_s25 = sshll.u32 %s1947_s24, 4  ;;  %s34_s25 = int_to_ptr.vmem [resolvable:$true] %s33_s25 }
   0x5   :  { %s1827_s26 = scalar_lea.vmem %s34_s25, 768  ;;  %p1832_p1 = scmp.lt.s32.totalorder %s34_s25, %s34_s25 }
   0x6   :  { %p1828_p0 = scmp.ne.s32.totalorder %s34_s25, %s1827_s26  ;;  %p1833_p2 = scmp.lt.s32.totalorder %s1827_s26, %s1827_s26 }
   0x8   :  { %p1834_p3 = por %p1833_p2, %p1832_p1 }
   0xa   :  { %p1835_p4 = pnand %p1834_p3, %p1828_p0 }
   0xc   :  { %1838 = shalt.err (!%p1835_p4)
}
   0xd   :  { %s1948_s27 = smov 256   ;;  %s1949_s28 = smov 16  }
   0xe   :  { %39 = dma.hbm_to_vmem [thread:$0]  %s2055_s1, 768, %s34_s25, [#allocation6], %s1948_s27, %s1948_s27, %s1949_s28  }
   0xf   :  { %s1950_s8 = smov [#allocation8]  }
  0x10   :  { %s55_s9 = sshll.u32 %s1950_s8, 4  ;;  %s56_s9 = int_to_ptr.vmem [resolvable:$true] %s55_s9 }
  0x11   :  { %s1847_s10 = scalar_lea.vmem %s56_s9, 12288  ;;  %p1852_p6 = scmp.lt.s32.totalorder %s56_s9, %s56_s9 }
  0x12   :  { %p1848_p5 = scmp.ne.s32.totalorder %s56_s9, %s1847_s10  ;;  %p1853_p7 = scmp.lt.s32.totalorder %s1847_s10, %s1847_s10 }
  0x14   :  { %p1854_p8 = por %p1853_p7, %p1852_p6 }
  0x16   :  { %p1855_p9 = pnand %p1854_p8, %p1848_p5 }
  0x18   :  { %1858 = shalt.err (!%p1855_p9)
}
  0x19   :  { %s1951_s11 = smov 192   ;;  %s1952_s12 = smov 12  }
  0x1a   :  { %61 = dma.hbm_to_vmem [thread:$0]  %s2057_s3, 12288, %s56_s9, [#allocation9], %s1951_s11, %s1951_s11, %s1952_s12  }
  0x1b   :  { %s1953_s15 = smov [#allocation2]  }
  0x1c   :  { %s21_s16 = sshll.u32 %s1953_s15, 4  ;;  %s22_s16 = int_to_ptr.vmem [resolvable:$true] %s21_s16 }
  0x1d   :  { %s1867_s1 = scalar_lea.vmem %s22_s16, 128  ;;  %p1872_p11 = scmp.lt.s32.totalorder %s22_s16, %s22_s16 }
  0x1e   :  { %p1868_p10 = scmp.ne.s32.totalorder %s22_s16, %s1867_s1  ;;  %p1873_p12 = scmp.lt.s32.totalorder %s1867_s1, %s1867_s1 }
  0x20   :  { %p1874_p13 = por %p1873_p12, %p1872_p11 }
  0x22   :  { %p1875_p0 = pnand %p1874_p13, %p1868_p10 }
  0x24   :  { %1878 = shalt.err (!%p1875_p0)
}
  0x25   :  { %s1954_s17 = smov 64   ;;  %s1955_s18 = smov 4  }
  0x26   :  { %27 = dma.hbm_to_vmem [thread:$0]  %s2054_s0, 128, %s22_s16, [#allocation3], %s1954_s17, %s1954_s17, %s1955_s18  }
  0x27   :  { %s1956_s21 = smov [#allocation7]   ;;  %s1957_s3 = smov [#allocation10]  }
  0x28   :  { %s46_s22 = sshll.u32 %s1956_s21, 4  ;;  %s69_s23 = sshll.u32 %s1957_s3, 4  ;;  %s47_s22 = int_to_ptr.vmem [resolvable:$true] %s46_s22  ;;  %s70_s23 = int_to_ptr.vmem [resolvable:$true] %s69_s23 }
  0x29   :  { %s1887_s24 = scalar_lea.vmem %s47_s22, 64  ;;  %p1892_p2 = scmp.lt.s32.totalorder %s47_s22, %s47_s22 }
  0x2a   :  { %p1888_p1 = scmp.ne.s32.totalorder %s47_s22, %s1887_s24  ;;  %p1893_p3 = scmp.lt.s32.totalorder %s1887_s24, %s1887_s24 }
  0x2c   :  { %p1894_p4 = por %p1893_p3, %p1892_p2 }
  0x2e   :  { %p1895_p5 = pnand %p1894_p4, %p1888_p1 }
  0x30   :  { %1898 = shalt.err (!%p1895_p5)
}
  0x31   :  { %49 = dma.hbm_to_vmem [thread:$0]  %s2056_s2, 64, %s47_s22, [#allocation6]  }
  0x32   :  { %s1907_s27 = scalar_lea.vmem %s70_s23, 3072  ;;  %p1912_p7 = scmp.lt.s32.totalorder %s70_s23, %s70_s23 }
  0x33   :  { %p1908_p6 = scmp.ne.s32.totalorder %s70_s23, %s1907_s27  ;;  %p1913_p8 = scmp.lt.s32.totalorder %s1907_s27, %s1907_s27 }
  0x35   :  { %p1914_p9 = por %p1913_p8, %p1912_p7 }
  0x37   :  { %p1915_p10 = pnand %p1914_p9, %p1908_p6 }
  0x39   :  { %1918 = shalt.err (!%p1915_p10)
}
  0x3a   :  { %75 = dma.hbm_to_vmem [thread:$0]  %s2059_s5, 3072, %s70_s23, [#allocation9], %s1954_s17, %s1954_s17, %s1955_s18  }
  0x3b   :  { %1939 = dma.done.wait [#allocation3], 128  }
  0x3c   :  { %1940 = vsyncadd [#allocation3], 4294967168 }
  0x3d   :  { %1941 = dma.done.wait [#allocation6], 832  }
  0x3e   :  { %1942 = vsyncadd [#allocation6], 4294966464 }
  0x3f   :  { %1943 = dma.done.wait [#allocation9], 15360  }
  0x40   :  { %1944 = vsyncadd [#allocation9], 4294951936  ;;  %v1958_v0 = vmov 0   ;;  %v100_v1 = vld [vmem:[#allocation5 + $0x20] sm:$0xff]  ;;  %vm163_vm0 = vcmask 1043456   ;;  %v101_v2 = vld [vmem:[#allocation5 + $0x28] sm:$0xff] }
  0x41   :  { %208 = vmatprep.mubr.bf16.mxu0 %v1958_v0  ;;  %251 = vmatprep.mubr.bf16.mxu1 %v1958_v0  ;;  %v1416_v3 = vcombine.high %v100_v1, %v100_v1  ;;  %v1418_v4 = vcombine.high %v101_v2, %v101_v2  ;;  %v1415_v5 = vcombine.low %v100_v1, %v100_v1  ;;  %v1660_v7 = vld [vmem:[#allocation5 + $0x4] ss:$16 sps:$4 sm:$0xff]   ;;  %v1662_v8 = vld [vmem:[#allocation5 + $0xc] ss:$16 sps:$4 sm:$0xff]   ;;  %v1664_v11 = vld [vmem:[#allocation5] ss:$16 sps:$4 sm:$0xff]  }
  0x42   :  { %v1417_v6 = vcombine.low %v101_v2, %v101_v2  ;;  %v1665_v12 = vld [vmem:[#allocation5 + $0x8] ss:$16 sps:$4 sm:$0xff]   ;;  %v1669_v13 = vld [vmem:[#allocation8 + $0xac] ss:$12 sps:$4 sm:$0xff]   ;;  %vm159_vm1 = vcmask 195584   ;;  %vm1960_vm2 = vmmov 0  }
  0x43   :  { %1419 = vmatprep.subr.msk.bf16.mxu0 %vm163_vm0, %v1416_v3  ;;  %1421 = vmatprep.subr.msk.bf16.mxu1 %vm163_vm0, %v1418_v4  ;;  %v165_v9 = vsel %vm163_vm0, %v1415_v5, 0  ;;  %v1666_v14 = vld [vmem:[#allocation2] sm:$0xff]   ;;  %v1672_v15 = vld [vmem:[#allocation8 + $0x22c] ss:$12 sps:$4 sm:$0xff]   ;;  %v1675_v18 = vld [vmem:[#allocation8 + $0x94] ss:$12 sps:$4 sm:$0xff]  }
  0x44   :  { %v171_v10 = vsel %vm163_vm0, %v1417_v6, 0  ;;  %189 = vmatpush1.bf16.msra.mxu0 %v165_v9  ;;  %v1667_v16 = vld [vmem:[#allocation8 + $0xa8] ss:$12 sps:$4 sm:$0xff]   ;;  %v1673_v20 = vld [vmem:[#allocation8 + $0x90] ss:$12 sps:$4 sm:$0xff]   ;;  %s1961_s30 = smov [#allocation11]  }
  0x45   :  { %232 = vmatpush1.bf16.msra.mxu1 %v171_v10  ;;  %190 = vmatprep.subr.bf16.mxu0 %v1660_v7  ;;  %v1670_v17 = vld [vmem:[#allocation8 + $0x228] ss:$12 sps:$4 sm:$0xff]   ;;  %v1676_v21 = vld [vmem:[#allocation8 + $0x210] ss:$12 sps:$4 sm:$0xff]   ;;  %v1679_v24 = vld [vmem:[#allocation8 + $0x78] ss:$12 sps:$4 sm:$0xff]  }
  0x46   :  { %233 = vmatprep.subr.bf16.mxu1 %v1662_v8  ;;  %v1678_v19 = vld [vmem:[#allocation8 + $0x214] ss:$12 sps:$4 sm:$0xff]   ;;  %v1681_v22 = vld [vmem:[#allocation8 + $0x7c] ss:$12 sps:$4 sm:$0xff]   ;;  %v1682_v25 = vld [vmem:[#allocation8 + $0x1f8] ss:$12 sps:$4 sm:$0xff]  }
  0x47   :  { %v1684_v23 = vld [vmem:[#allocation8 + $0x1fc] ss:$12 sps:$4 sm:$0xff]   ;;  %v1687_v26 = vld [vmem:[#allocation8 + $0x64] ss:$12 sps:$4 sm:$0xff]   ;;  %v1685_v28 = vld [vmem:[#allocation8 + $0x60] ss:$12 sps:$4 sm:$0xff]  }
  0x48   :  { %191 = vmatpush1.bf16.msra.mxu0 %v1664_v11  ;;  %v1690_v27 = vld [vmem:[#allocation8 + $0x1e4] ss:$12 sps:$4 sm:$0xff]   ;;  %v1688_v29 = vld [vmem:[#allocation8 + $0x1e0] ss:$12 sps:$4 sm:$0xff]   ;;  %v1691_v32 = vld [vmem:[#allocation8 + $0x48] ss:$12 sps:$4 sm:$0xff]  }
  0x49   :  { %234 = vmatpush1.bf16.msra.mxu1 %v1665_v12  ;;  %931 = vmatprep.subr.bf16.mxu0 %v1669_v13  ;;  %v1693_v30 = vld [vmem:[#allocation8 + $0x4c] ss:$12 sps:$4 sm:$0xff]   ;;  %v1694_v33 = vld [vmem:[#allocation8 + $0x1c8] ss:$12 sps:$4 sm:$0xff]   ;;  %v1697_v36 = vld [vmem:[#allocation8 + $0x30] ss:$12 sps:$4 sm:$0xff]  }
  0x4a   :  { %974 = vmatprep.subr.bf16.mxu1 %v1672_v15  ;;  %v1696_v31 = vld [vmem:[#allocation8 + $0x1cc] ss:$12 sps:$4 sm:$0xff]   ;;  %v1699_v34 = vld [vmem:[#allocation8 + $0x34] ss:$12 sps:$4 sm:$0xff]   ;;  %v1700_v37 = vld [vmem:[#allocation8 + $0x1b0] ss:$12 sps:$4 sm:$0xff]  }
  0x4b   :  { %1420 = vmatmul.mubr.msk.bf16.vlgmr.msra.gmra.mxu0 %vm159_vm1, %v1666_v14  ;;  %v1702_v35 = vld [vmem:[#allocation8 + $0x1b4] ss:$12 sps:$4 sm:$0xff]   ;;  %v1705_v38 = vld [vmem:[#allocation8 + $0x1c] ss:$12 sps:$4 sm:$0xff]   ;;  %v1703_v40 = vld [vmem:[#allocation8 + $0x18] ss:$12 sps:$4 sm:$0xff]  }
  0x4c   :  { %1422 = vmatmul.mubr.msk.bf16.vlgmr.msra.gmra.mxu1 %vm159_vm1, %v1666_v14  ;;  %932 = vmatpush1.bf16.msra.mxu0 %v1667_v16  ;;  %v1708_v39 = vld [vmem:[#allocation8 + $0x19c] ss:$12 sps:$4 sm:$0xff]   ;;  %v1706_v41 = vld [vmem:[#allocation8 + $0x198] ss:$12 sps:$4 sm:$0xff]   ;;  %v1709_v44 = vld [vmem:[#allocation8] ss:$12 sps:$4 sm:$0xff]   ;;  %v104_v16 = vlaneseq }
  0x4d   :  { %975 = vmatpush1.bf16.msra.mxu1 %v1670_v17  ;;  %933 = vmatprep.subr.bf16.mxu0 %v1675_v18  ;;  %v1711_v42 = vld [vmem:[#allocation8 + $0x4] ss:$12 sps:$4 sm:$0xff]   ;;  %v1712_v45 = vld [vmem:[#allocation8 + $0x180] ss:$12 sps:$4 sm:$0xff]   ;;  %v1715_v48 = vld [vmem:[#allocation8 + $0x168] ss:$12 sps:$4 sm:$0xff]  }
  0x4e   :  { %976 = vmatprep.subr.bf16.mxu1 %v1678_v19  ;;  %v1714_v43 = vld [vmem:[#allocation8 + $0x184] ss:$12 sps:$4 sm:$0xff]   ;;  %v1717_v46 = vld [vmem:[#allocation8 + $0x16c] ss:$12 sps:$4 sm:$0xff]   ;;  %v1718_v49 = vld [vmem:[#allocation8 + $0x2e8] ss:$12 sps:$4 sm:$0xff]  }
  0x4f   :  { %v1720_v47 = vld [vmem:[#allocation8 + $0x2ec] ss:$12 sps:$4 sm:$0xff]   ;;  %v1723_v50 = vld [vmem:[#allocation8 + $0x154] ss:$12 sps:$4 sm:$0xff]   ;;  %v1721_v52 = vld [vmem:[#allocation8 + $0x150] ss:$12 sps:$4 sm:$0xff]  }
  0x50   :  { %934 = vmatpush1.bf16.msra.mxu0 %v1673_v20  ;;  %v1726_v51 = vld [vmem:[#allocation8 + $0x2d4] ss:$12 sps:$4 sm:$0xff]   ;;  %v1724_v53 = vld [vmem:[#allocation8 + $0x2d0] ss:$12 sps:$4 sm:$0xff]   ;;  %v1727_v56 = vld [vmem:[#allocation8 + $0x138] ss:$12 sps:$4 sm:$0xff]  }
  0x51   :  { %977 = vmatpush1.bf16.msra.mxu1 %v1676_v21  ;;  %935 = vmatprep.subr.bf16.mxu0 %v1681_v22  ;;  %v1729_v54 = vld [vmem:[#allocation8 + $0x13c] ss:$12 sps:$4 sm:$0xff]   ;;  %v1730_v57 = vld [vmem:[#allocation8 + $0x2b8] ss:$12 sps:$4 sm:$0xff]   ;;  %v1733_v60 = vld [vmem:[#allocation8 + $0x120] ss:$12 sps:$4 sm:$0xff]  }
  0x52   :  { %978 = vmatprep.subr.bf16.mxu1 %v1684_v23  ;;  %v1732_v55 = vld [vmem:[#allocation8 + $0x2bc] ss:$12 sps:$4 sm:$0xff]   ;;  %v1735_v58 = vld [vmem:[#allocation8 + $0x124] ss:$12 sps:$4 sm:$0xff]   ;;  %v1736_v61 = vld [vmem:[#allocation8 + $0x2a0] ss:$12 sps:$4 sm:$0xff]  }
  0x53   :  { %v1738_v59 = vld [vmem:[#allocation8 + $0x2a4] ss:$12 sps:$4 sm:$0xff]   ;;  %v1741_v62 = vld [vmem:[#allocation8 + $0x10c] ss:$12 sps:$4 sm:$0xff]   ;;  %v1739_v0 = vld [vmem:[#allocation8 + $0x108] ss:$12 sps:$4 sm:$0xff]  }
  0x54   :  { %936 = vmatpush1.bf16.msra.mxu0 %v1679_v24  ;;  %v1744_v63 = vld [vmem:[#allocation8 + $0x28c] ss:$12 sps:$4 sm:$0xff]   ;;  %v1742_v1 = vld [vmem:[#allocation8 + $0x288] ss:$12 sps:$4 sm:$0xff]   ;;  %v1745_v4 = vld [vmem:[#allocation8 + $0xf0] ss:$12 sps:$4 sm:$0xff]  }
  0x55   :  { %979 = vmatpush1.bf16.msra.mxu1 %v1682_v25  ;;  %937 = vmatprep.subr.bf16.mxu0 %v1687_v26  ;;  %v1747_v2 = vld [vmem:[#allocation8 + $0xf4] ss:$12 sps:$4 sm:$0xff]   ;;  %v1748_v5 = vld [vmem:[#allocation8 + $0x270] ss:$12 sps:$4 sm:$0xff]   ;;  %v1751_v8 = vld [vmem:[#allocation8 + $0xd8] ss:$12 sps:$4 sm:$0xff]  }
  0x56   :  { %980 = vmatprep.subr.bf16.mxu1 %v1690_v27  ;;  %v1750_v3 = vld [vmem:[#allocation8 + $0x274] ss:$12 sps:$4 sm:$0xff]   ;;  %v1753_v6 = vld [vmem:[#allocation8 + $0xdc] ss:$12 sps:$4 sm:$0xff]   ;;  %v1754_v9 = vld [vmem:[#allocation8 + $0x258] ss:$12 sps:$4 sm:$0xff]  }
  0x57   :  { %v1756_v7 = vld [vmem:[#allocation8 + $0x25c] ss:$12 sps:$4 sm:$0xff]   ;;  %v1759_v10 = vld [vmem:[#allocation8 + $0xc4] ss:$12 sps:$4 sm:$0xff]   ;;  %v1757_v12 = vld [vmem:[#allocation8 + $0xc0] ss:$12 sps:$4 sm:$0xff]  }
  0x58   :  { %938 = vmatpush1.bf16.msra.mxu0 %v1685_v28  ;;  %v1762_v11 = vld [vmem:[#allocation8 + $0x244] ss:$12 sps:$4 sm:$0xff]   ;;  %v1760_v13 = vld [vmem:[#allocation8 + $0x240] ss:$12 sps:$4 sm:$0xff]   ;;  %v2019_v17 = vshrl.u32 %v104_v16, 7  ;;  %s1396_s8 = sshll.u32 %s1961_s30, 4  ;;  %s1397_s8 = int_to_ptr.vmem [resolvable:$true] %s1396_s8 }
  0x59   :  { %981 = vmatpush1.bf16.msra.mxu1 %v1688_v29  ;;  %939 = vmatprep.subr.bf16.mxu0 %v1693_v30  ;;  %v1763_v14 = vld [vmem:[#allocation8 + $0x170] ss:$12 sps:$4 sm:$0xff]   ;;  %v1790_v16 = vld [vmem:[#allocation8 + $0x1a0] ss:$12 sps:$4 sm:$0xff]   ;;  %s1919_s9 = scalar_lea.vmem %s1397_s8, 256  ;;  %p1924_p12 = scmp.lt.s32.totalorder %s1397_s8, %s1397_s8 }
  0x5a   :  { %982 = vmatprep.subr.bf16.mxu1 %v1696_v31  ;;  %v1764_v15 = vld [vmem:[#allocation8 + $0x2f0] ss:$12 sps:$4 sm:$0xff]   ;;  %v110_v18 = vsub.s32 1, %v2019_v17  ;;  %v118_v19 = vsub.s32 3, %v2019_v17  ;;  %v106_v20 = vsub.s32 0, %v2019_v17  ;;  %v114_v21 = vsub.s32 2, %v2019_v17  ;;  %p1920_p11 = scmp.ne.s32.totalorder %s1397_s8, %s1919_s9  ;;  %p1925_p13 = scmp.lt.s32.totalorder %s1919_s9, %s1919_s9 }
  0x5b   :  { %v102_v22 = vld [vmem:[#allocation7] sm:$0xf] }
  0x5c   :  { %940 = vmatpush1.bf16.msra.mxu0 %v1691_v32  ;;  %v111_v25 = vrot.slane %v102_v22, %v110_v18  ;;  %v119_v26 = vrot.slane %v102_v22, %v118_v19  ;;  %v107_v27 = vrot.slane %v102_v22, %v106_v20  ;;  %v115_v28 = vrot.slane %v102_v22, %v114_v21  ;;  %v1791_v19 = vld [vmem:[#allocation8 + $0xc8] ss:$12 sps:$4 sm:$0xff]   ;;  %p1926_p0 = por %p1925_p13, %p1924_p12 }
  0x5d   :  { %983 = vmatpush1.bf16.msra.mxu1 %v1694_v33  ;;  %941 = vmatprep.subr.bf16.mxu0 %v1699_v34  ;;  %v1792_v22 = vld [vmem:[#allocation8 + $0x248] ss:$12 sps:$4 sm:$0xff]  }
  0x5e   :  { %984 = vmatprep.subr.bf16.mxu1 %v1702_v35  ;;  %p1927_p1 = pnand %p1926_p0, %p1920_p11 }
  0x60   :  { %942 = vmatpush1.bf16.msra.mxu0 %v1697_v36 }
  0x61   :  { %985 = vmatpush1.bf16.msra.mxu1 %v1700_v37  ;;  %943 = vmatprep.subr.bf16.mxu0 %v1705_v38 }
  0x62   :  { %986 = vmatprep.subr.bf16.mxu1 %v1708_v39 }
  0x64   :  { %944 = vmatpush1.bf16.msra.mxu0 %v1703_v40 }
  0x65   :  { %987 = vmatpush1.bf16.msra.mxu1 %v1706_v41  ;;  %945 = vmatprep.subr.bf16.mxu0 %v1711_v42 }
  0x66   :  { %988 = vmatprep.subr.bf16.mxu1 %v1714_v43 }
  0x68   :  { %946 = vmatpush1.bf16.msra.mxu0 %v1709_v44 }
  0x69   :  { %989 = vmatpush1.bf16.msra.mxu1 %v1712_v45  ;;  %947 = vmatprep.subr.bf16.mxu0 %v1717_v46 }
  0x6a   :  { %990 = vmatprep.subr.bf16.mxu1 %v1720_v47 }
  0x6c   :  { %948 = vmatpush2.bf16.msra.mxu0 %v1715_v48 }
  0x6d   :  { %991 = vmatpush2.bf16.msra.mxu1 %v1718_v49  ;;  %949 = vmatprep.subr.bf16.mxu0 %v1723_v50 }
  0x6e   :  { %992 = vmatprep.subr.bf16.mxu1 %v1726_v51 }
  0x70   :  { %950 = vmatpush2.bf16.msra.mxu0 %v1721_v52 }
  0x71   :  { %993 = vmatpush2.bf16.msra.mxu1 %v1724_v53  ;;  %951 = vmatprep.subr.bf16.mxu0 %v1729_v54  ;;  %v1765_v53 = vld [vmem:[#allocation8 + $0xb0] ss:$12 sps:$4 sm:$0xff]  }
  0x72   :  { %994 = vmatprep.subr.bf16.mxu1 %v1732_v55  ;;  %v1766_v54 = vld [vmem:[#allocation8 + $0x230] ss:$12 sps:$4 sm:$0xff]  }
  0x74   :  { %952 = vmatpush2.bf16.msra.mxu0 %v1727_v56 }
  0x75   :  { %995 = vmatpush2.bf16.msra.mxu1 %v1730_v57  ;;  %953 = vmatprep.subr.bf16.mxu0 %v1735_v58  ;;  %v1767_v57 = vld [vmem:[#allocation8 + $0x158] ss:$12 sps:$4 sm:$0xff]  }
  0x76   :  { %996 = vmatprep.subr.bf16.mxu1 %v1738_v59  ;;  %v1768_v58 = vld [vmem:[#allocation8 + $0x2d8] ss:$12 sps:$4 sm:$0xff]  }
  0x77   :  { %v1769_v59 = vld [vmem:[#allocation8 + $0x98] ss:$12 sps:$4 sm:$0xff]  }
  0x78   :  { %954 = vmatpush2.bf16.msra.mxu0 %v1733_v60  ;;  %v1770_v60 = vld [vmem:[#allocation8 + $0x218] ss:$12 sps:$4 sm:$0xff]  }
  0x79   :  { %997 = vmatpush2.bf16.msra.mxu1 %v1736_v61  ;;  %955 = vmatprep.subr.bf16.mxu0 %v1741_v62  ;;  %v1771_v61 = vld [vmem:[#allocation8 + $0x140] ss:$12 sps:$4 sm:$0xff]  }
  0x7a   :  { %998 = vmatprep.subr.bf16.mxu1 %v1744_v63  ;;  %v1772_v62 = vld [vmem:[#allocation8 + $0x2c0] ss:$12 sps:$4 sm:$0xff]  }
  0x7b   :  { %v1773_v63 = vld [vmem:[#allocation8 + $0x80] ss:$12 sps:$4 sm:$0xff]  }
  0x7c   :  { %956 = vmatpush2.bf16.msra.mxu0 %v1739_v0  ;;  %v1774_v0 = vld [vmem:[#allocation8 + $0x200] ss:$12 sps:$4 sm:$0xff]  }
  0x7d   :  { %999 = vmatpush2.bf16.msra.mxu1 %v1742_v1  ;;  %957 = vmatprep.subr.bf16.mxu0 %v1747_v2  ;;  %v1775_v1 = vld [vmem:[#allocation8 + $0x128] ss:$12 sps:$4 sm:$0xff]  }
  0x7e   :  { %1000 = vmatprep.subr.bf16.mxu1 %v1750_v3  ;;  %v1776_v2 = vld [vmem:[#allocation8 + $0x2a8] ss:$12 sps:$4 sm:$0xff]  }
  0x7f   :  { %v1777_v3 = vld [vmem:[#allocation8 + $0x68] ss:$12 sps:$4 sm:$0xff]  }
  0x80   :  { %958 = vmatpush2.bf16.msra.mxu0 %v1745_v4  ;;  %v1778_v4 = vld [vmem:[#allocation8 + $0x1e8] ss:$12 sps:$4 sm:$0xff]  }
  0x81   :  { %1001 = vmatpush2.bf16.msra.mxu1 %v1748_v5  ;;  %959 = vmatprep.subr.bf16.mxu0 %v1753_v6  ;;  %v1779_v5 = vld [vmem:[#allocation8 + $0x110] ss:$12 sps:$4 sm:$0xff]  }
  0x82   :  { %1002 = vmatprep.subr.bf16.mxu1 %v1756_v7  ;;  %v1780_v6 = vld [vmem:[#allocation8 + $0x290] ss:$12 sps:$4 sm:$0xff]  }
  0x83   :  { %v1781_v7 = vld [vmem:[#allocation8 + $0x50] ss:$12 sps:$4 sm:$0xff]  }
  0x84   :  { %960 = vmatpush2.bf16.msra.mxu0 %v1751_v8  ;;  %v1782_v8 = vld [vmem:[#allocation8 + $0x1d0] ss:$12 sps:$4 sm:$0xff]  }
  0x85   :  { %1003 = vmatpush2.bf16.msra.mxu1 %v1754_v9  ;;  %961 = vmatprep.subr.bf16.mxu0 %v1759_v10  ;;  %v1783_v9 = vld [vmem:[#allocation8 + $0xf8] ss:$12 sps:$4 sm:$0xff]  }
  0x86   :  { %1004 = vmatprep.subr.bf16.mxu1 %v1762_v11  ;;  %v1784_v10 = vld [vmem:[#allocation8 + $0x278] ss:$12 sps:$4 sm:$0xff]  }
  0x87   :  { %v1785_v11 = vld [vmem:[#allocation8 + $0x38] ss:$12 sps:$4 sm:$0xff]  }
  0x88   :  { %962 = vmatpush2.bf16.msra.mxu0 %v1757_v12  ;;  %v1786_v12 = vld [vmem:[#allocation8 + $0x1b8] ss:$12 sps:$4 sm:$0xff]  }
  0x89   :  { %1005 = vmatpush2.bf16.msra.mxu1 %v1760_v13  ;;  %1544 = vmatprep.subr.bf16.mxu0 %v1763_v14  ;;  %v1787_v13 = vld [vmem:[#allocation8 + $0xe0] ss:$12 sps:$4 sm:$0xff]  }
  0x8a   :  { %1566 = vmatprep.subr.bf16.mxu1 %v1764_v15  ;;  %v1788_v14 = vld [vmem:[#allocation8 + $0x260] ss:$12 sps:$4 sm:$0xff]  }
  0x8b   :  { %v1789_v15 = vld [vmem:[#allocation8 + $0x20] ss:$12 sps:$4 sm:$0xff]  }
 0x10b   :  { %v210_v23 = vpop.f32.mrf.mxu0 }
 0x10c   :  { %v253_v24 = vpop.f32.mrf.mxu1  ;;  %v211_v37 = vadd.f32 %v210_v23, %v107_v27  ;;  %v1793_v23 = vld [vmem:[#allocation8 + $0x8] ss:$12 sps:$4 sm:$0xff]  }
 0x10d   :  { %v212_v29 = vpop.f32.mrf.mxu0  ;;  %v254_v38 = vadd.f32 %v253_v24, %v115_v28  ;;  %v1794_v24 = vld [vmem:[#allocation8 + $0x188] ss:$12 sps:$4 sm:$0xff]  }
 0x10e   :  { %v255_v30 = vpop.f32.mrf.mxu1  ;;  %v213_v33 = vadd.f32 %v212_v29, %v111_v25  ;;  %v262_v49 = vmax.f32 %v211_v37, 0.0  ;;  %v1799_v29 = vld [vmem:[#allocation10 + $0x68] sm:$0xff]  }
 0x10f   :  { %v214_v31 = vpop.f32.mrf.mxu0  ;;  %v256_v34 = vadd.f32 %v255_v30, %v119_v26  ;;  %v264_v50 = vmax.f32 %v254_v38, 0.0  ;;  %v1800_v30 = vld [vmem:[#allocation10 + $0x28] sm:$0xff]  }
 0x110   :  { %v257_v32 = vpop.f32.mrf.mxu1  ;;  %v215_v35 = vadd.f32 %v214_v31, %v107_v27  ;;  %v263_v45 = vmax.f32 %v213_v33, 0.0  ;;  %v1797_v27 = vld [vmem:[#allocation10 + $0x70] sm:$0xff]   ;;  %v1801_v31 = vld [vmem:[#allocation10 + $0x60] sm:$0xff]   ;;  %v1803_v33 = vld [vmem:[#allocation10 + $0x58] sm:$0xff]  }
 0x111   :  { %v258_v36 = vadd.f32 %v257_v32, %v115_v28  ;;  %v216_v39 = vpop.f32.mrf.mxu0  ;;  %v265_v46 = vmax.f32 %v256_v34, 0.0  ;;  %v1798_v28 = vld [vmem:[#allocation10 + $0x30] sm:$0xff]   ;;  %v1802_v32 = vld [vmem:[#allocation10 + $0x20] sm:$0xff]   ;;  %v1804_v34 = vld [vmem:[#allocation10 + $0x18] sm:$0xff]  }
 0x112   :  { %v259_v40 = vpop.f32.mrf.mxu1  ;;  %v217_v41 = vadd.f32 %v216_v39, %v111_v25  ;;  %v266_v43 = vmax.f32 %v215_v35, 0.0  ;;  %v1795_v25 = vld [vmem:[#allocation10 + $0x78] sm:$0xff]   ;;  %v1805_v35 = vld [vmem:[#allocation10 + $0x50] sm:$0xff]   ;;  %v1807_v37 = vld [vmem:[#allocation10 + $0x48] sm:$0xff]  }
 0x113   :  { %v260_v42 = vadd.f32 %v259_v40, %v119_v26  ;;  %v268_v44 = vmax.f32 %v258_v36, 0.0  ;;  %v1796_v26 = vld [vmem:[#allocation10 + $0x38] sm:$0xff]   ;;  %v1806_v36 = vld [vmem:[#allocation10 + $0x10] sm:$0xff]   ;;  %v1808_v38 = vld [vmem:[#allocation10 + $0x8] sm:$0xff]  }
 0x114   :  { %v267_v47 = vmax.f32 %v217_v41, 0.0  ;;  %v2031_v55 = vpack.c.bf16 %v266_v43, %v262_v49  ;;  %v1809_v39 = vld [vmem:[#allocation10 + $0x40] sm:$0xff]   ;;  %v1811_v41 = vld [vmem:[#allocation10 + $0xb8] sm:$0xff]   ;;  %v1812_v43 = vld [vmem:[#allocation10 + $0xb0] sm:$0xff]  }
 0x115   :  { %v269_v48 = vmax.f32 %v260_v42, 0.0  ;;  %v2033_v56 = vpack.c.bf16 %v268_v44, %v264_v50  ;;  %v1810_v40 = vld [vmem:[#allocation10] sm:$0xff]   ;;  %v1959_v42 = vmov 0.0   ;;  %v1813_v44 = vld [vmem:[#allocation10 + $0xa8] sm:$0xff]  }
 0x116   :  { %v271_v51 = vpack.c.bf16 %v267_v47, %v263_v45  ;;  %v1814_v45 = vld [vmem:[#allocation10 + $0xa0] sm:$0xff]   ;;  %v1816_v47 = vld [vmem:[#allocation10 + $0x90] sm:$0xff]  }
 0x117   :  { %v273_v52 = vpack.c.bf16 %v269_v48, %v265_v46  ;;  %v1815_v46 = vld [vmem:[#allocation10 + $0x98] sm:$0xff]   ;;  %v1817_v48 = vld [vmem:[#allocation10 + $0x88] sm:$0xff]   ;;  %v1818_v49 = vld [vmem:[#allocation10 + $0x80] sm:$0xff]  }
 0x118   :  { %963 = vmatprep.mubr.bf16.mxu0 %v271_v51  ;;  %v402_v50 = vld [vmem:[%s2058_s4] sm:$0x7] }
 0x119   :  { %1006 = vmatprep.mubr.bf16.mxu1 %v273_v52  ;;  %964 = vmatmul.mubr.bf16.vlgmr.msra.gmra.mxu0 %v2031_v55 }
 0x11a   :  { %1007 = vmatmul.mubr.bf16.vlgmr.msra.gmra.mxu1 %v2033_v56  ;;  %1545 = vmatpush3.bf16.msra.mxu0 %v1765_v53 }
 0x11b   :  { %1567 = vmatpush3.bf16.msra.mxu1 %v1766_v54  ;;  %1049 = vmatprep.mubr.bf16.mxu0 %v271_v51  ;;  %v411_v51 = vrot.slane %v402_v50, %v110_v18 }
 0x11c   :  { %1090 = vmatprep.mubr.bf16.mxu1 %v273_v52  ;;  %1546 = vmatprep.subr.bf16.mxu0 %v1767_v57  ;;  %v407_v52 = vrot.slane %v402_v50, %v106_v20 }
 0x11d   :  { %1568 = vmatprep.subr.bf16.mxu1 %v1768_v58 }
 0x11e   :  { %1547 = vmatpush3.bf16.msra.mxu0 %v1769_v59 }
 0x11f   :  { %1569 = vmatpush3.bf16.msra.mxu1 %v1770_v60  ;;  %1548 = vmatprep.subr.bf16.mxu0 %v1771_v61 }
 0x120   :  { %1570 = vmatprep.subr.bf16.mxu1 %v1772_v62 }
 0x122   :  { %1549 = vmatpush3.bf16.msra.mxu0 %v1773_v63 }
 0x123   :  { %1571 = vmatpush3.bf16.msra.mxu1 %v1774_v0  ;;  %1550 = vmatprep.subr.bf16.mxu0 %v1775_v1 }
 0x124   :  { %1572 = vmatprep.subr.bf16.mxu1 %v1776_v2 }
 0x126   :  { %1551 = vmatpush3.bf16.msra.mxu0 %v1777_v3 }
 0x127   :  { %1573 = vmatpush3.bf16.msra.mxu1 %v1778_v4  ;;  %1552 = vmatprep.subr.bf16.mxu0 %v1779_v5 }
 0x128   :  { %1574 = vmatprep.subr.bf16.mxu1 %v1780_v6 }
 0x12a   :  { %1553 = vmatpush3.bf16.msra.mxu0 %v1781_v7 }
 0x12b   :  { %1575 = vmatpush3.bf16.msra.mxu1 %v1782_v8  ;;  %1554 = vmatprep.subr.bf16.mxu0 %v1783_v9 }
 0x12c   :  { %1576 = vmatprep.subr.bf16.mxu1 %v1784_v10 }
 0x12e   :  { %1555 = vmatpush3.bf16.msra.mxu0 %v1785_v11  ;;  %v415_v11 = vrot.slane %v402_v50, %v114_v21 }
 0x12f   :  { %1577 = vmatpush3.bf16.msra.mxu1 %v1786_v12  ;;  %1556 = vmatprep.subr.bf16.mxu0 %v1787_v13 }
 0x130   :  { %1578 = vmatprep.subr.bf16.mxu1 %v1788_v14 }
 0x132   :  { %1557 = vmatpush3.bf16.msra.mxu0 %v1789_v15 }
 0x133   :  { %1579 = vmatpush3.bf16.msra.mxu1 %v1790_v16  ;;  %1558 = vmatprep.subr.bf16.mxu0 %v1791_v19 }
 0x134   :  { %1580 = vmatprep.subr.bf16.mxu1 %v1792_v22 }
 0x136   :  { %1559 = vmatpush3.bf16.msra.mxu0 %v1793_v23 }
 0x137   :  { %1581 = vmatpush3.bf16.msra.mxu1 %v1794_v24  ;;  %1588 = vmatprep.subr.bf16.mxu0 %v1795_v25 }
 0x138   :  { %1619 = vmatprep.subr.bf16.mxu1 %v1959_v42 }
 0x139   :  { %1050 = vmatmul.mubr.bf16.vlgmr.msra.gmra.mxu0 %v2031_v55 }
 0x13a   :  { %1091 = vmatmul.mubr.bf16.vlgmr.msra.gmra.mxu1 %v2033_v56  ;;  %1589 = vmatpush3.bf16.msra.mxu0 %v1796_v26 }
 0x13b   :  { %1590 = vmatprep.subr.bf16.mxu0 %v1797_v27  ;;  %1620 = vmatpush3.bf16.msra.mxu1 %v1811_v41 }
 0x13c   :  { %1621 = vmatprep.subr.bf16.mxu1 %v1959_v42  ;;  %1635 = vmatprep.mubr.msk.bf16.mxu1 %vm1960_vm2, %v1959_v42 }
 0x13e   :  { %1591 = vmatpush3.bf16.msra.mxu0 %v1798_v28 }
 0x13f   :  { %1592 = vmatprep.subr.bf16.mxu0 %v1799_v29  ;;  %1622 = vmatpush3.bf16.msra.mxu1 %v1812_v43 }
 0x140   :  { %1623 = vmatprep.subr.bf16.mxu1 %v1959_v42 }
 0x142   :  { %1593 = vmatpush3.bf16.msra.mxu0 %v1800_v30 }
 0x143   :  { %1594 = vmatprep.subr.bf16.mxu0 %v1801_v31  ;;  %1624 = vmatpush3.bf16.msra.mxu1 %v1813_v44 }
 0x144   :  { %1625 = vmatprep.subr.bf16.mxu1 %v1959_v42 }
 0x146   :  { %1595 = vmatpush3.bf16.msra.mxu0 %v1802_v32 }
 0x147   :  { %1596 = vmatprep.subr.bf16.mxu0 %v1803_v33  ;;  %1626 = vmatpush3.bf16.msra.mxu1 %v1814_v45 }
 0x148   :  { %1627 = vmatprep.subr.bf16.mxu1 %v1959_v42 }
 0x14a   :  { %1597 = vmatpush3.bf16.msra.mxu0 %v1804_v34 }
 0x14b   :  { %1598 = vmatprep.subr.bf16.mxu0 %v1805_v35  ;;  %1628 = vmatpush3.bf16.msra.mxu1 %v1815_v46 }
 0x14c   :  { %1629 = vmatprep.subr.bf16.mxu1 %v1959_v42 }
 0x14e   :  { %1599 = vmatpush3.bf16.msra.mxu0 %v1806_v36  ;;  %v1519_v36 = vld [vmem:[%s2060_s6] ss:$0 sm:$0xff] }
 0x14f   :  { %1600 = vmatprep.subr.bf16.mxu0 %v1807_v37  ;;  %1630 = vmatpush3.bf16.msra.mxu1 %v1816_v47 }
 0x150   :  { %1631 = vmatprep.subr.bf16.mxu1 %v1959_v42 }
 0x152   :  { %1601 = vmatpush3.bf16.msra.mxu0 %v1808_v38 }
 0x153   :  { %1602 = vmatprep.subr.bf16.mxu0 %v1809_v39  ;;  %1632 = vmatpush3.bf16.msra.mxu1 %v1817_v48 }
 0x154   :  { %1633 = vmatprep.subr.bf16.mxu1 %v1959_v42 }
 0x156   :  { %1603 = vmatpush3.bf16.msra.mxu0 %v1810_v40 }
 0x157   :  { %1634 = vmatpush3.bf16.msra.mxu1 %v1818_v49 }
 0x1d9   :  { %v965_v53 = vpop.f32.mrf.mxu0 }
 0x1da   :  { %v1008_v54 = vpop.f32.mrf.mxu1  ;;  %v966_v58 = vadd.f32 %v965_v53, %v407_v52 }
 0x1db   :  { %v967_v55 = vpop.f32.mrf.mxu0 }
 0x1dc   :  { %v1010_v56 = vpop.f32.mrf.mxu1  ;;  %v968_v57 = vadd.f32 %v967_v55, %v411_v51  ;;  %v1009_v2 = vadd.f32 %v1008_v54, %v966_v58 }
 0x1dd   :  { %v969_v59 = vpop.f32.mrf.mxu0 }
 0x1de   :  { %v1012_v60 = vpop.f32.mrf.mxu1  ;;  %v970_v61 = vadd.f32 %v969_v59, %v407_v52  ;;  %v1011_v63 = vadd.f32 %v1010_v56, %v968_v57  ;;  %v1099_v20 = vmax.f32 %v1009_v2, 0.0 }
 0x1df   :  { %v971_v62 = vpop.f32.mrf.mxu0 }
 0x1e0   :  { %v1013_v0 = vadd.f32 %v1012_v60, %v970_v61  ;;  %v972_v1 = vadd.f32 %v971_v62, %v411_v51  ;;  %v1014_v3 = vpop.f32.mrf.mxu1  ;;  %v1100_v5 = vmax.f32 %v1011_v63, 0.0 }
 0x1e2   :  { %v1015_v4 = vadd.f32 %v1014_v3, %v972_v1  ;;  %v1102_v18 = vmax.f32 %v1013_v0, 0.0 }
 0x1e4   :  { %v1103_v6 = vmax.f32 %v1015_v4, 0.0  ;;  %v1105_v8 = vpack.c.bf16 %v1102_v18, %v1099_v20 }
 0x1e6   :  { %v1106_v7 = vpack.c.bf16 %v1103_v6, %v1100_v5 }
 0x1e8   :  { %1339 = vmatprep.mubr.bf16.mxu0 %v1106_v7 }
 0x1e9   :  { %1340 = vmatmul.mubr.bf16.vlgmr.msra.gmra.mxu0 %v1105_v8 }
 0x1f9   :  { %v1560_v9 = vpop.f32.mrf.mxu0 }
 0x1fa   :  { %v1582_v10 = vpop.f32.mrf.mxu1 }
 0x1fb   :  { %v1561_v12 = vpop.f32.mrf.mxu0 }
 0x1fc   :  { %v1583_v13 = vpop.f32.mrf.mxu1  ;;  %v1562_v14 = vadd.f32 %v1561_v12, %v1560_v9 }
 0x1fd   :  { %v1563_v15 = vpop.f32.mrf.mxu0  ;;  %v1584_v24 = vadd.f32 %v1583_v13, %v1582_v10 }
 0x1fe   :  { %v1585_v16 = vpop.f32.mrf.mxu1  ;;  %v1052_v19 = vadd.f32 %v1562_v14, %v415_v11 }
 0x1ff   :  { %v1564_v22 = vpop.f32.mrf.mxu0 }
 0x200   :  { %v1586_v23 = vpop.f32.mrf.mxu1  ;;  %v1565_v25 = vadd.f32 %v1564_v22, %v1563_v15  ;;  %v1093_v26 = vadd.f32 %v1584_v24, %v1052_v19 }
 0x201   :  { %v1587_v28 = vadd.f32 %v1586_v23, %v1585_v16 }
 0x202   :  { %v1055_v27 = vadd.f32 %v1565_v25, %v415_v11  ;;  %v1101_v30 = vmax.f32 %v1093_v26, 0.0 }
 0x204   :  { %v1096_v29 = vadd.f32 %v1587_v28, %v1055_v27 }
 0x206   :  { %v1104_v31 = vmax.f32 %v1096_v29, 0.0 }
 0x208   :  { %v1107_v32 = vpack.c.bf16 %v1104_v31, %v1101_v30 }
 0x20a   :  { %1636 = vmatmul.mubr.bf16.vlgmr.msra.gmra.mxu1 %v1107_v32 }
 0x2a9   :  { %v1604_v17 = vpop.f32.mrf.mxu0 }
 0x2ab   :  { %v1605_v21 = vpop.f32.mrf.mxu0 }
 0x2ac   :  { %v1606_v34 = vadd.f32 %v1605_v21, %v1604_v17 }
 0x2ad   :  { %v1607_v33 = vpop.f32.mrf.mxu0 }
 0x2ae   :  { %v1342_v38 = vadd.f32 %v1606_v34, %v1519_v36 }
 0x2af   :  { %v1608_v35 = vpop.f32.mrf.mxu0 }
 0x2b0   :  { %v1609_v37 = vadd.f32 %v1608_v35, %v1607_v33 }
 0x2b2   :  { %v1345_v42 = vadd.f32 %v1609_v37, %v1519_v36 }
 0x2ca   :  { %v1382_v39 = vpop.f32.mrf.mxu1 }
 0x2cb   :  { %v1383_v40 = vadd.f32 %v1382_v39, %v1342_v38 }
 0x2cc   :  { %v1637_v41 = vpop.f32.mrf.mxu1 }
 0x2cd   :  { %1389 = vst [vmem:[#allocation11] sm:$0xff] %v1383_v40 }
 0x2ce   :  { %v1385_v43 = vpop.f32.mrf.mxu1 }
 0x2cf   :  { %v1386_v44 = vadd.f32 %v1385_v43, %v1345_v42 }
 0x2d0   :  { %v1638_v45 = vpop.f32.mrf.mxu1 }
 0x2d1   :  { %1390 = vst [vmem:[#allocation11 + $0x8] sm:$0xff] %v1386_v44 }
 0x2d2   :  { %1930 = shalt.err (!%p1927_p1)
}
 0x2d3   :  { %s1962_s6 = smov 128   ;;  %s1963_s10 = smov 8  }
 0x2d4   :  { %1402 = dma.vmem_to_hbm [thread:$0]  %s1397_s8, 256, %s2061_s7, [#allocation4], %s1962_s6, %s1962_s6, %s1963_s10  }
 0x2d5   :  { %1945 = dma.done.wait [#allocation4], 256  }
 0x2d6   :  { %1946 = vsyncadd [#allocation4], 4294967040 }
 0x2d7   :  { %1406 = vsyncpa [#allocation3], 1 }
 0x2d8   :  { %1407 = vsyncpa [#allocation6], 1 }
 0x2d9   :  { %1408 = vsyncpa [#allocation9], 1 }
 0x2da   :  { %1409 = vsyncpa [#allocation4], 1 }

</bundles_post_ra>
